<compile_context>
chip_gen: v7x
topology: tpu7x:2x2x1
jax: 0.10.0
libtpu: 0.0.40
codegen_flags: <defaults>
</compile_context>

<pallas_src>
import functools
import math

import jax
import jax.numpy as jnp
from jax.experimental import pallas as pl
from jax.experimental.pallas import tpu as pltpu


# ----------------------------------------------------------------------------
# Parameter setup (pure JAX; done once, outside the hot path)
# ----------------------------------------------------------------------------
def make_pe_table(d_model, max_len=5000, dtype=jnp.float32):
    """Deterministic sinusoidal table, shape (max_len, d_model).

    Matches torch: pe[:, 0::2] = sin(pos * div), pe[:, 1::2] = cos(pos * div).
    """
    position = jnp.arange(max_len, dtype=jnp.float32)[:, None]              # (L, 1)
    div_term = jnp.exp(
        jnp.arange(0, d_model, 2, dtype=jnp.float32) * (-math.log(10000.0) / d_model)
    )                                                                        # (D/2,)
    ang = position * div_term                                                # (L, D/2)
    pe = jnp.stack([jnp.sin(ang), jnp.cos(ang)], axis=-1).reshape(max_len, d_model)
    return pe.astype(dtype)


# ----------------------------------------------------------------------------
# Kernels
# ----------------------------------------------------------------------------
def _pe_add_kernel(x_ref, pe_ref, o_ref):
    # Eval mode (dropout is identity): pure streaming add.
    x = x_ref[...]
    pe = pe_ref[...]
    if x.dtype == jnp.float32:
        o_ref[...] = x + pe
    else:
        # Compute in f32, cast once at the store (cheap on v6e/v7x, needed on v5e).
        o_ref[...] = (x.astype(jnp.float32) + pe.astype(jnp.float32)).astype(o_ref.dtype)


def _pe_add_dropout_kernel(x_ref, pe_ref, bits_ref, o_ref, *, p):
    # Train mode: add + inverted dropout (keep prob 1-p, scale kept by 1/(1-p)).
    y = x_ref[...].astype(jnp.float32) + pe_ref[...].astype(jnp.float32)
    # uint32 threshold, clamped so p very close to 1 cannot wrap to 0.
    threshold = jnp.uint32(min(int(round(p * float(2 ** 32))), 2 ** 32 - 1))
    keep = bits_ref[...] >= threshold                 # P(keep) = 1 - p
    scale = jnp.float32(1.0 / (1.0 - p))
    y = jnp.where(keep, y * scale, jnp.zeros_like(y))
    o_ref[...] = y.astype(o_ref.dtype)


# ----------------------------------------------------------------------------
# Wrapper
# ----------------------------------------------------------------------------
def _choose_block_s(S, row_bytes, target_tile_bytes=2 << 20):
    """Largest seq tile (divisor of S, multiple of 8 or S itself) whose
    per-step working set stays near `target_tile_bytes`."""
    max_rows = max(1, target_tile_bytes // max(row_bytes, 1))
    if S <= max_rows:
        return S                      # single block: no grid-step overhead
    candidates = [S]
    for d in range(8, S + 1, 8):
        if S % d == 0:
            candidates.append(d)
    fitting = [c for c in candidates if c <= max_rows]
    if fitting:
        return max(fitting)
    return min(candidates)


def positional_encoding(x, pe_table, *, p=0.1, training=False, key=None,
                        block_s=None, vmem_limit_bytes=48 * 1024 * 1024):
    """x: (S, B, D); pe_table: (max_len, D). Returns dropout(x + pe[:S])."""
    S, B, D = x.shape
    use_dropout = bool(training) and p > 0.0
    if use_dropout and p >= 1.0:
        # torch.nn.Dropout(p=1.0) zeroes everything (and 1/(1-p) is undefined).
        return jnp.zeros_like(x)

    # Lane-dense 2-D view of x (free: row-major reshape).
    x2 = x.reshape(S, B * D)
    # Pre-broadcast PE over batch, in x.dtype, so the kernel streams a slab
    # with exactly the same layout as x (no in-kernel broadcast or cast).
    pe2 = jnp.broadcast_to(
        pe_table[:S, None, :].astype(x.dtype), (S, B, D)
    ).reshape(S, B * D)

    bytes_per_row = B * D * (2 * x.dtype.itemsize        # x in + out
                             + x.dtype.itemsize          # pe
                             + (4 if use_dropout else 0))  # uint32 bits
    if block_s is None:
        block_s = _choose_block_s(S, bytes_per_row)
    assert S % block_s == 0

    blk = pl.BlockSpec((block_s, B * D), lambda i: (i, 0))

    if use_dropout:
        if key is None:
            key = jax.random.PRNGKey(0)
        bits = jax.random.bits(key, (S, B * D), dtype=jnp.uint32)
        kernel = functools.partial(_pe_add_dropout_kernel, p=float(p))
        in_specs = [blk, blk, blk]
        args = (x2, pe2, bits)
    else:
        kernel = _pe_add_kernel
        in_specs = [blk, blk]
        args = (x2, pe2)

    out2 = pl.pallas_call(
        kernel,
        out_shape=jax.ShapeDtypeStruct((S, B * D), x.dtype),
        grid=(S // block_s,),
        in_specs=in_specs,
        out_specs=blk,
        compiler_params=pltpu.CompilerParams(
            dimension_semantics=("parallel",),      # independent tiles -> megacore OK
            vmem_limit_bytes=vmem_limit_bytes,
        ),
    )(*args)
    return out2.reshape(S, B, D)


# ----------------------------------------------------------------------------
# Demo / self-check
# ----------------------------------------------------------------------------
if __name__ == "__main__":
    S, B, D = 16, 2, 32          # seq_len, batch, d_model
    MAX_LEN = 64
    P_DROP = 0.1

    key = jax.random.PRNGKey(0)
    kx, kdrop = jax.random.split(key)
    x = jax.random.normal(kx, (S, B, D), dtype=jnp.float32)
    pe_table = make_pe_table(D, max_len=MAX_LEN)

    # Eval mode (dropout = identity): deterministic, check against plain-JAX ref.
    out_eval = jax.block_until_ready(
        positional_encoding(x, pe_table, p=P_DROP, training=False))
    ref = x + pe_table[:S][:, None, :]
    assert out_eval.shape == (S, B, D)
    assert jnp.allclose(out_eval, ref, atol=1e-6), "mismatch vs reference (eval)"

    # Train mode: kept entries must equal ref/(1-p); dropped entries are 0.
    out_train = jax.block_until_ready(
        positional_encoding(x, pe_table, p=P_DROP, training=True, key=kdrop))
    assert out_train.shape == (S, B, D)
    kept = out_train != 0
    assert jnp.allclose(jnp.where(kept, out_train, 0.0),
                        jnp.where(kept, ref / (1.0 - P_DROP), 0.0),
                        atol=1e-5), "mismatch vs reference (train)"

    print("KERNEL_OK")
</pallas_src>

<mosaic_0001>
module attributes {stable_mosaic.version = 11 : i64} {
  func.func @_pe_add_kernel(%arg0: i32, %arg1: memref<16x64xf32, #tpu.memory_space<vmem>>, %arg2: memref<16x64xf32, #tpu.memory_space<vmem>>, %arg3: memref<16x64xf32, #tpu.memory_space<vmem>>) attributes {dimension_semantics = [#tpu.dimension_semantics<parallel>], iteration_bounds = array<i64: 1>, scalar_prefetch = 0 : i64, scratch_operands = 0 : i64, tpu.core_type = #tpu.core_type<tc>, window_params = [{transform_indices = @transform_0, window_bounds = array<i64: 16, 64>}, {transform_indices = @transform_1, window_bounds = array<i64: 16, 64>}, {transform_indices = @transform_2, window_bounds = array<i64: 16, 64>}]} {
    %c0 = arith.constant 0 : index
    %c0_0 = arith.constant 0 : index
    %0 = vector.load %arg1[%c0, %c0_0] : memref<16x64xf32, #tpu.memory_space<vmem>>, vector<16x64xf32>
    %c0_1 = arith.constant 0 : index
    %c0_2 = arith.constant 0 : index
    %1 = vector.load %arg2[%c0_1, %c0_2] : memref<16x64xf32, #tpu.memory_space<vmem>>, vector<16x64xf32>
    %2 = arith.addf %0, %1 : vector<16x64xf32>
    %c0_3 = arith.constant 0 : index
    %c0_4 = arith.constant 0 : index
    %3 = vector.load %arg3[%c0_3, %c0_4] : memref<16x64xf32, #tpu.memory_space<vmem>>, vector<16x64xf32>
    tpu.vector_store %arg3[%c0_3, %c0_4], %2 {strides = array<i32>} : memref<16x64xf32, #tpu.memory_space<vmem>>, vector<16x64xf32>,
    return
  }
  func.func @transform_0(%arg0: i32) -> (i32, i32) {
    %c0_i32 = arith.constant 0 : i32
    %c0_i32_0 = arith.constant 0 : i32
    return %arg0, %c0_i32 : i32, i32
  }
  func.func @transform_1(%arg0: i32) -> (i32, i32) {
    %c0_i32 = arith.constant 0 : i32
    %c0_i32_0 = arith.constant 0 : i32
    return %arg0, %c0_i32 : i32, i32
  }
  func.func @transform_2(%arg0: i32) -> (i32, i32) {
    %c0_i32 = arith.constant 0 : i32
    %c0_i32_0 = arith.constant 0 : i32
    return %arg0, %c0_i32 : i32, i32
  }
}

</mosaic_0001>

<bundles_post_ra>
// kernel: tpu_custom_call.1
= control target key start
LH: loop header
LB: loop body
LE: loop exit
PB: predicated region body
PF: predicated region fallthrough
CT: control target
= control target key end

     0   :  { %7 = vsyncpa [#allocation3], 0  ;;  %s209_s0 = inlined_call_operand.hbm [shape: f32[16,64], index: 0, kind: input, shape index: {}]   ;;  %s210_s1 = inlined_call_operand.hbm [shape: f32[16,64], index: 1, kind: input, shape index: {}]   ;;  %s211_s2 = inlined_call_operand.hbm [shape: f32[16,64], index: 2, kind: output, shape index: {}]  }
   0x1   :  { %8 = vsyncpa [#allocation6], 0 }
   0x2   :  { %9 = vsyncpa [#allocation4], 0  ;;  %s144_s9 = smov [#allocation2]   ;;  %s72_s13 = scalar_lea.hbm %s209_s0, 256 }
   0x3   :  { %s15_s10 = sshll.u32 %s144_s9, 4  ;;  %p73_p0 = scmp.ne.s32.totalorder %s209_s0, %s72_s13  ;;  %s16_s10 = int_to_ptr.vmem [resolvable:$true] %s15_s10 }
   0x4   :  { %p76_p1 = scmp.lt.u32.totalorder %s72_s13, %s209_s0 }
   0x6   :  { %p78_p2 = pnand %p76_p1, %p73_p0 }
   0x8   :  { %81 = shalt.err (!%p78_p2)
}
   0x9   :  { %s82_s18 = scalar_lea.vmem %s16_s10, 256  ;;  %p87_p4 = scmp.lt.s32.totalorder %s16_s10, %s16_s10 }
   0xa   :  { %p83_p3 = scmp.ne.s32.totalorder %s16_s10, %s82_s18  ;;  %p88_p5 = scmp.lt.s32.totalorder %s82_s18, %s82_s18 }
   0xc   :  { %p89_p6 = por %p88_p5, %p87_p4 }
   0xe   :  { %p90_p7 = pnand %p89_p6, %p83_p3 }
  0x10   :  { %93 = shalt.err (!%p90_p7)
}
  0x11   :  { %s145_s19 = smov 128   ;;  %s146_s20 = smov 8  }
  0x12   :  { %21 = dma.hbm_to_vmem [thread:$0]  %s209_s0, 256, %s16_s10, [#allocation3], %s145_s19, %s145_s19, %s146_s20  }
  0x13   :  { %s147_s23 = smov [#allocation5]   ;;  %s94_s27 = scalar_lea.hbm %s210_s1, 256 }
  0x14   :  { %s27_s24 = sshll.u32 %s147_s23, 4  ;;  %p95_p8 = scmp.ne.s32.totalorder %s210_s1, %s94_s27  ;;  %s28_s24 = int_to_ptr.vmem [resolvable:$true] %s27_s24 }
  0x15   :  { %p98_p9 = scmp.lt.u32.totalorder %s94_s27, %s210_s1 }
  0x17   :  { %p100_p10 = pnand %p98_p9, %p95_p8 }
  0x19   :  { %103 = shalt.err (!%p100_p10)
}
  0x1a   :  { %s104_s4 = scalar_lea.vmem %s28_s24, 256  ;;  %p109_p12 = scmp.lt.s32.totalorder %s28_s24, %s28_s24 }
  0x1b   :  { %p105_p11 = scmp.ne.s32.totalorder %s28_s24, %s104_s4  ;;  %p110_p13 = scmp.lt.s32.totalorder %s104_s4, %s104_s4 }
  0x1d   :  { %p111_p0 = por %p110_p13, %p109_p12 }
  0x1f   :  { %p112_p1 = pnand %p111_p0, %p105_p11 }
  0x21   :  { %115 = shalt.err (!%p112_p1)
}
  0x22   :  { %33 = dma.hbm_to_vmem [thread:$0]  %s210_s1, 256, %s28_s24, [#allocation6], %s145_s19, %s145_s19, %s146_s20  }
  0x23   :  { %138 = dma.done.wait [#allocation3], 256  }
  0x24   :  { %139 = vsyncadd [#allocation3], 4294967040 }
  0x25   :  { %140 = dma.done.wait [#allocation6], 256  }
  0x26   :  { %141 = vsyncadd [#allocation6], 4294967040  ;;  %s148_s6 = smov [#allocation7]   ;;  %v40_v0 = vld [vmem:[#allocation2] sm:$0xff]  ;;  %v42_v1 = vld [vmem:[#allocation5] sm:$0xff]  ;;  %vm46_vm0 = vcmask 523264  }
  0x27   :  { %s54_s7 = sshll.u32 %s148_s6, 4  ;;  %v41_v2 = vld [vmem:[#allocation2 + $0x8] sm:$0xff]  ;;  %v44_v3 = vadd.f32 %v42_v1, %v40_v0  ;;  %v43_v4 = vld [vmem:[#allocation5 + $0x8] sm:$0xff]  ;;  %s55_s7 = int_to_ptr.vmem [resolvable:$true] %s54_s7 }
  0x28   :  { %v45_v5 = vadd.f32 %v43_v4, %v41_v2  ;;  %s116_s8 = scalar_lea.vmem %s55_s7, 256  ;;  %p121_p3 = scmp.lt.s32.totalorder %s55_s7, %s55_s7 }
  0x29   :  { %47 = vst.msk [vmem:[#allocation7] sm:$0xff] %vm46_vm0, %v44_v3  ;;  %p117_p2 = scmp.ne.s32.totalorder %s55_s7, %s116_s8  ;;  %p122_p4 = scmp.lt.s32.totalorder %s116_s8, %s116_s8 }
  0x2a   :  { %48 = vst.msk [vmem:[#allocation7 + $0x8] sm:$0xff] %vm46_vm0, %v45_v5 }
  0x2b   :  { %p123_p5 = por %p122_p4, %p121_p3 }
  0x2d   :  { %p124_p6 = pnand %p123_p5, %p117_p2 }
  0x2f   :  { %127 = shalt.err (!%p124_p6)
}
  0x30   :  { %s128_s10 = scalar_lea.hbm %s211_s2, 256 }
  0x31   :  { %p129_p7 = scmp.ne.s32.totalorder %s211_s2, %s128_s10  ;;  %p132_p8 = scmp.lt.u32.totalorder %s128_s10, %s211_s2 }
  0x33   :  { %p134_p9 = pnand %p132_p8, %p129_p7 }
  0x35   :  { %137 = shalt.err (!%p134_p9)
}
  0x36   :  { %60 = dma.vmem_to_hbm [thread:$0]  %s55_s7, 256, %s211_s2, [#allocation4], %s145_s19, %s145_s19, %s146_s20  }
  0x37   :  { %142 = dma.done.wait [#allocation4], 256  }
  0x38   :  { %143 = vsyncadd [#allocation4], 4294967040 }
  0x39   :  { %64 = vsyncpa [#allocation3], 1 }
  0x3a   :  { %65 = vsyncpa [#allocation6], 1 }
  0x3b   :  { %66 = vsyncpa [#allocation4], 1 }

</bundles_post_ra>
